<compile_context>
chip_gen: v7x
topology: tpu7x:2x2x1
jax: 0.10.0
libtpu: 0.0.40
codegen_flags: <defaults>
</compile_context>

<pallas_src>
import functools

import jax
import jax.numpy as jnp
from jax.experimental import pallas as pl
from jax.experimental.pallas import tpu as pltpu


def _group_norm_kernel(x_ref, w_ref, b_ref, o_ref, *, eps, inv_n, inv_nm1):
    # x_ref: (1, Gt, Cg, HW)   w_ref, b_ref: (1, Gt, Cg, 1)
    x = x_ref[...].astype(jnp.float32)

    # Single pass over x: per-group sum and sum of squares (f32 accumulation).
    s = jnp.sum(jnp.sum(x, axis=-1, keepdims=True), axis=-2, keepdims=True)
    ss = jnp.sum(jnp.sum(x * x, axis=-1, keepdims=True), axis=-2, keepdims=True)
    mean = s * inv_n                                   # (1, Gt, 1, 1)
    # Unbiased variance (torch .var() default): (E[x^2]*n - n*mean^2)/(n-1).
    # maximum() guards against tiny negative values from cancellation.
    var = jnp.maximum((ss - s * mean) * inv_nm1, 0.0)
    inv_std = jax.lax.rsqrt(var + eps)                 # EUP, ~free slot

    w = w_ref[...].astype(jnp.float32)                 # (1, Gt, Cg, 1)
    b = b_ref[...].astype(jnp.float32)
    scale = w * inv_std                                # per-channel scale
    shift = b - mean * scale                           # per-channel shift
    # One FMA per element, broadcast along the lane (HW) axis.
    o_ref[...] = (x * scale + shift).astype(o_ref.dtype)


def group_norm(x, weight, bias, num_groups=32, eps=1e-5,
               target_block_bytes=4 * 1024 * 1024):
    """x: (N, C, H, W); weight, bias: (1, C, 1, 1). Returns (N, C, H, W)."""
    N, C, H, W = x.shape
    G = num_groups
    assert C % G == 0
    Cg = C // G
    HW = H * W
    n_elem = Cg * HW
    assert n_elem > 1, "unbiased variance requires >= 2 elements per group"

    # VMEM footprint of one group's (Cg, HW) slab after (8, 128) tile padding.
    pad_cg = -(-Cg // 8) * 8
    pad_hw = -(-HW // 128) * 128
    group_vmem = pad_cg * pad_hw * 4  # f32 bytes

    # Gt = largest divisor of G whose block stays under the per-step target,
    # so each DMA is big enough to approach the HBM roofline.
    Gt = 1
    for d in range(1, G + 1):
        if G % d == 0 and d * group_vmem <= target_block_bytes:
            Gt = d
    n_gb = G // Gt

    # TODO(synk): if a single group alone exceeds the VMEM budget (very large
    # Cg*HW on v7x), split HW onto an "arbitrary" grid axis with sum/sumsq
    # scratch accumulators and a second normalize sweep.

    block_vmem = Gt * group_vmem
    # Budget: 2x double-buffered in + 2x out + ~2 f32 temps, capped for v7x.
    vmem_limit = int(min(64 * 1024 * 1024,
                         max(32 * 1024 * 1024, 6 * block_vmem + (4 << 20))))

    x_r = x.reshape(N * n_gb, Gt, Cg, HW)
    w_r = weight.reshape(n_gb, Gt, Cg, 1)
    b_r = bias.reshape(n_gb, Gt, Cg, 1)

    if n_gb == 1:
        # Constant block index -> weight/bias stay resident, never re-DMAed.
        wb_idx = lambda i: (0, 0, 0, 0)
    else:
        wb_idx = lambda i: (i % n_gb, 0, 0, 0)

    kernel = functools.partial(
        _group_norm_kernel,
        eps=float(eps),
        inv_n=1.0 / float(n_elem),
        inv_nm1=1.0 / float(n_elem - 1),
    )

    out = pl.pallas_call(
        kernel,
        out_shape=jax.ShapeDtypeStruct((N * n_gb, Gt, Cg, HW), x.dtype),
        grid_spec=pltpu.PrefetchScalarGridSpec(
            num_scalar_prefetch=0,
            grid=(N * n_gb,),  # single flat parallel axis (balances 2 TCs on v7x)
            in_specs=[
                pl.BlockSpec((1, Gt, Cg, HW), lambda i: (i, 0, 0, 0)),
                pl.BlockSpec((1, Gt, Cg, 1), wb_idx),
                pl.BlockSpec((1, Gt, Cg, 1), wb_idx),
            ],
            out_specs=pl.BlockSpec((1, Gt, Cg, HW), lambda i: (i, 0, 0, 0)),
        ),
        compiler_params=pltpu.CompilerParams(
            dimension_semantics=("parallel",),
            vmem_limit_bytes=vmem_limit),
    )(x_r, w_r, b_r)

    return out.reshape(N, C, H, W)


def _reference_group_norm(x, weight, bias, num_groups, eps):
    # Pure-JAX reference mirroring the PyTorch module exactly.
    N, C, H, W = x.shape
    G = num_groups
    xr = x.reshape(N, G, -1).astype(jnp.float32)
    mean = xr.mean(-1, keepdims=True)
    var = xr.var(-1, keepdims=True, ddof=1)  # torch .var() default: unbiased
    xh = (xr - mean) / jnp.sqrt(var + eps)
    xh = xh.reshape(N, C, H, W)
    return xh * weight + bias


if __name__ == "__main__":
    key = jax.random.PRNGKey(0)
    N, C, H, W = 2, 4, 16, 16
    num_groups = 2  # must divide C; module default is 32 (use with C=64+)
    eps = 1e-5

    x = jax.random.normal(key, (N, C, H, W), dtype=jnp.float32)

    # Module __init__ uses ones / zeros; use deterministic non-trivial values
    # to exercise the affine path.
    weight = (1.0 + 0.1 * jnp.arange(C, dtype=jnp.float32)).reshape(1, C, 1, 1)
    bias = (0.01 * jnp.arange(C, dtype=jnp.float32)).reshape(1, C, 1, 1)

    out = group_norm(x, weight, bias, num_groups=num_groups, eps=eps)
    out = jax.block_until_ready(out)

    ref = _reference_group_norm(x, weight, bias, num_groups, eps)
    assert out.shape == (N, C, H, W)
    assert jnp.allclose(out, ref, atol=1e-4, rtol=1e-4), (
        float(jnp.max(jnp.abs(out - ref))))

    print("KERNEL_OK")
</pallas_src>

<mosaic_0001>
module attributes {stable_mosaic.version = 11 : i64} {
  func.func @_group_norm_kernel(%arg0: i32, %arg1: memref<1x2x2x256xf32, #tpu.memory_space<vmem>>, %arg2: memref<1x2x2x1xf32, #tpu.memory_space<vmem>>, %arg3: memref<1x2x2x1xf32, #tpu.memory_space<vmem>>, %arg4: memref<1x2x2x256xf32, #tpu.memory_space<vmem>>) attributes {dimension_semantics = [#tpu.dimension_semantics<parallel>], iteration_bounds = array<i64: 2>, scalar_prefetch = 0 : i64, scratch_operands = 0 : i64, tpu.core_type = #tpu.core_type<tc>, window_params = [{transform_indices = @transform_0, window_bounds = array<i64: 1, 2, 2, 256>}, {pipeline_mode = #tpu.pipeline_mode<synchronous>, transform_indices = @transform_1, window_bounds = array<i64: 1, 2, 2, 1>}, {pipeline_mode = #tpu.pipeline_mode<synchronous>, transform_indices = @transform_2, window_bounds = array<i64: 1, 2, 2, 1>}, {transform_indices = @transform_3, window_bounds = array<i64: 1, 2, 2, 256>}]} {
    %c0 = arith.constant 0 : index
    %c0_0 = arith.constant 0 : index
    %c0_1 = arith.constant 0 : index
    %c0_2 = arith.constant 0 : index
    %0 = vector.load %arg1[%c0, %c0_0, %c0_1, %c0_2] : memref<1x2x2x256xf32, #tpu.memory_space<vmem>>, vector<1x2x2x256xf32>
    %cst = arith.constant dense<0.000000e+00> : vector<1x2x2xf32>
    %1 = vector.multi_reduction <add>, %0, %cst [3] : vector<1x2x2x256xf32> to vector<1x2x2xf32>
    %2 = vector.shape_cast %1 : vector<1x2x2xf32> to vector<1x2x2x1xf32>
    %cst_3 = arith.constant dense<0.000000e+00> : vector<1x2x1xf32>
    %3 = vector.multi_reduction <add>, %2, %cst_3 [2] : vector<1x2x2x1xf32> to vector<1x2x1xf32>
    %4 = vector.shape_cast %3 : vector<1x2x1xf32> to vector<1x2x1x1xf32>
    %5 = arith.mulf %0, %0 : vector<1x2x2x256xf32>
    %cst_4 = arith.constant dense<0.000000e+00> : vector<1x2x2xf32>
    %6 = vector.multi_reduction <add>, %5, %cst_4 [3] : vector<1x2x2x256xf32> to vector<1x2x2xf32>
    %7 = vector.shape_cast %6 : vector<1x2x2xf32> to vector<1x2x2x1xf32>
    %cst_5 = arith.constant dense<0.000000e+00> : vector<1x2x1xf32>
    %8 = vector.multi_reduction <add>, %7, %cst_5 [2] : vector<1x2x2x1xf32> to vector<1x2x1xf32>
    %9 = vector.shape_cast %8 : vector<1x2x1xf32> to vector<1x2x1x1xf32>
    %cst_6 = arith.constant 0.001953125 : f32
    %10 = vector.broadcast %cst_6 : f32 to vector<1x2x1x1xf32>
    %11 = arith.mulf %4, %10 : vector<1x2x1x1xf32>
    %12 = arith.mulf %4, %11 : vector<1x2x1x1xf32>
    %13 = arith.subf %9, %12 : vector<1x2x1x1xf32>
    %cst_7 = arith.constant 0.00195694715 : f32
    %14 = vector.broadcast %cst_7 : f32 to vector<1x2x1x1xf32>
    %15 = arith.mulf %13, %14 : vector<1x2x1x1xf32>
    %cst_8 = arith.constant 0.000000e+00 : f32
    %16 = vector.broadcast %cst_8 : f32 to vector<1x2x1x1xf32>
    %17 = arith.maximumf %15, %16 : vector<1x2x1x1xf32>
    %cst_9 = arith.constant 9.99999974E-6 : f32
    %18 = vector.broadcast %cst_9 : f32 to vector<1x2x1x1xf32>
    %19 = arith.addf %17, %18 : vector<1x2x1x1xf32>
    %20 = math.rsqrt %19 : vector<1x2x1x1xf32>
    %c0_10 = arith.constant 0 : index
    %c0_11 = arith.constant 0 : index
    %c0_12 = arith.constant 0 : index
    %c0_13 = arith.constant 0 : index
    %21 = vector.load %arg2[%c0_10, %c0_11, %c0_12, %c0_13] : memref<1x2x2x1xf32, #tpu.memory_space<vmem>>, vector<1x2x2x1xf32>
    %c0_14 = arith.constant 0 : index
    %c0_15 = arith.constant 0 : index
    %c0_16 = arith.constant 0 : index
    %c0_17 = arith.constant 0 : index
    %22 = vector.load %arg3[%c0_14, %c0_15, %c0_16, %c0_17] : memref<1x2x2x1xf32, #tpu.memory_space<vmem>>, vector<1x2x2x1xf32>
    %23 = vector.broadcast %20 : vector<1x2x1x1xf32> to vector<1x2x2x1xf32>
    %24 = arith.mulf %21, %23 : vector<1x2x2x1xf32>
    %25 = vector.broadcast %11 : vector<1x2x1x1xf32> to vector<1x2x2x1xf32>
    %26 = arith.mulf %25, %24 : vector<1x2x2x1xf32>
    %27 = arith.subf %22, %26 : vector<1x2x2x1xf32>
    %28 = vector.broadcast %24 : vector<1x2x2x1xf32> to vector<1x2x2x256xf32>
    %29 = arith.mulf %0, %28 : vector<1x2x2x256xf32>
    %30 = vector.broadcast %27 : vector<1x2x2x1xf32> to vector<1x2x2x256xf32>
    %31 = arith.addf %29, %30 : vector<1x2x2x256xf32>
    %c0_18 = arith.constant 0 : index
    %c0_19 = arith.constant 0 : index
    %c0_20 = arith.constant 0 : index
    %c0_21 = arith.constant 0 : index
    %32 = vector.load %arg4[%c0_18, %c0_19, %c0_20, %c0_21] : memref<1x2x2x256xf32, #tpu.memory_space<vmem>>, vector<1x2x2x256xf32>
    tpu.vector_store %arg4[%c0_18, %c0_19, %c0_20, %c0_21], %31 {strides = array<i32>} : memref<1x2x2x256xf32, #tpu.memory_space<vmem>>, vector<1x2x2x256xf32>,
    return
  }
  func.func @transform_0(%arg0: i32) -> (i32, i32, i32, i32) {
    %c0_i32 = arith.constant 0 : i32
    %c0_i32_0 = arith.constant 0 : i32
    %c0_i32_1 = arith.constant 0 : i32
    %c0_i32_2 = arith.constant 0 : i32
    return %arg0, %c0_i32, %c0_i32_0, %c0_i32_1 : i32, i32, i32, i32
  }
  func.func @transform_1(%arg0: i32) -> (i32, i32, i32, i32) {
    %c0_i32 = arith.constant 0 : i32
    %c0_i32_0 = arith.constant 0 : i32
    %c0_i32_1 = arith.constant 0 : i32
    %c0_i32_2 = arith.constant 0 : i32
    %c0_i32_3 = arith.constant 0 : i32
    return %c0_i32, %c0_i32_0, %c0_i32_1, %c0_i32_2 : i32, i32, i32, i32
  }
  func.func @transform_2(%arg0: i32) -> (i32, i32, i32, i32) {
    %c0_i32 = arith.constant 0 : i32
    %c0_i32_0 = arith.constant 0 : i32
    %c0_i32_1 = arith.constant 0 : i32
    %c0_i32_2 = arith.constant 0 : i32
    %c0_i32_3 = arith.constant 0 : i32
    return %c0_i32, %c0_i32_0, %c0_i32_1, %c0_i32_2 : i32, i32, i32, i32
  }
  func.func @transform_3(%arg0: i32) -> (i32, i32, i32, i32) {
    %c0_i32 = arith.constant 0 : i32
    %c0_i32_0 = arith.constant 0 : i32
    %c0_i32_1 = arith.constant 0 : i32
    %c0_i32_2 = arith.constant 0 : i32
    return %arg0, %c0_i32, %c0_i32_0, %c0_i32_1 : i32, i32, i32, i32
  }
}

</mosaic_0001>

<bundles_post_ra>
// kernel: tpu_custom_call.1
= control target key start
LH: loop header
LB: loop body
LE: loop exit
PB: predicated region body
PF: predicated region fallthrough
CT: control target
= control target key end

     0   :  { %8 = vsyncpa [#allocation3], 0  ;;  %s859_s0 = inlined_call_operand.hbm [shape: f32[2,2,2,256], index: 0, kind: input, shape index: {}]   ;;  %s860_s1 = inlined_call_operand.vmem [shape: f32[1,2,2,1], index: 1, kind: input, shape index: {}]   ;;  %s861_s2 = inlined_call_operand.vmem [shape: f32[1,2,2,1], index: 2, kind: input, shape index: {}]   ;;  %s862_s3 = inlined_call_operand.hbm [shape: f32[2,2,2,256], index: 3, kind: output, shape index: {}]  }
   0x1   :  { %10 = vsyncpa [#allocation3 + $0x1], 0 }
   0x2   :  { %11 = vsyncpa [#allocation4], 0 }
   0x3   :  { %13 = vsyncpa [#allocation4 + $0x1], 0  ;;  %s653_s12 = smov 0   ;;  %s655_s13 = smov 0  }
   0x4   :  { %s657_s14 = smov 0   ;;  %s659_s15 = smov 0  }
   0x5 LB: > { %s674_s16 = sadd.s32 4294967295, %s622_s15   ;;  %s451_s17 = sadd.s32 4294967294, %s622_s15   ;;  %s622_s15 = sphi %s659_s15, %s875_s15   ;;  %s618_s14 = sphi %s657_s14, %s874_s14   ;;  %s614_s13 = sphi %s655_s13, %s873_s13   ;;  %s610_s12 = sphi %s653_s12, %s872_s12  }
   0x6   : > { %s678_s18 = sadd.s32 1, %s622_s15   ;;  %s26_s19 = sadd.s32 1, %s618_s14 }
   0x7   : > { %s23_s20 = ssub.s32 %s622_s15, %s678_s18  ;;  %p33_p0 = scmp.ne.s32.totalorder %s618_s14, %s614_s13 }
   0x8   : > { %p24_p1 = scmp.eq.s32.totalorder %s23_s20, 0  ;;  %p34_p2 = scmp.eq.s32.totalorder %s622_s15, 0 }
   0x9   : > { %p39_p3 = scmp.ne.s32.totalorder %s614_s13, %s610_s12  ;;  %p40_p4 = scmp.eq.s32.totalorder %s674_s16, 0 }
   0xa   : > { %s690_s21 = scalar_select %p24_p1, %s618_s14, %s26_s19  }
   0xb   : > { %p692_p5 = por %p34_p2, %p33_p0  ;;  %p696_p6 = por %p40_p4, %p39_p3 }
   0xc   : > { %p105_p7 = scmp.eq.s32.totalorder %s674_s16, 1  ;;  %p111_p8 = scmp.eq.s32.totalorder %s451_s17, 1 }
   0xd   : > { %p479_p10 = scmp.lt.s32.totalorder %s622_s15, 2  ;;  %s137_s26 = sand.u32 1, %s618_s14  }
   0xe   : > { %p703_p11 = por %p105_p7, %p33_p0  ;;  %p707_p12 = por %p111_p8, %p39_p3 }
   0xf   : > { %s465_s27 = sshll.u32 %s622_s15, 7  ;;  %s454_s28 = sshll.u32 %s137_s26, 3 }
  0x10   : > { %s866_s24 = scalar_select %p703_p11, 1, 0 }
  0x11   : > { %s867_s25 = scalar_select %p707_p12, 1, 0 }
  0x12   : > { %s716_s4 = scalar_lea.hbm %s859_s0, %s465_s27  ;;  %s141_s5 = scalar_lea.vmem [#allocation2], %s454_s28 }
  0x13   : > { %s148_s6 = sshll.u32 %s141_s5, 4  ;;  %p720_p13 = pnand %p479_p10, %p692_p5  ;;  %s724_s6 = int_to_ptr.vmem [resolvable:$true] %s148_s6 }
  0x14   : > { %s726_s8 = scalar_lea.sflag [#allocation3], %s137_s26  ;;  %s526_s9 = scalar_lea.hbm %s716_s4, 128 }
  0x15   : > { %p527_p0 = scmp.ne.s32.totalorder %s716_s4, %s526_s9  ;;  %p528_p1 = pneg %p720_p13 }
  0x16   : > { %s531_s17 = scalar_lea.hbm %s859_s0, 256  ;;  %p532_p4 = scmp.lt.u32.totalorder %s716_s4, %s859_s0 }
  0x17   : > { %p529_p2 = pnand %p528_p1, %p527_p0  ;;  %p533_p5 = scmp.lt.u32.totalorder %s531_s17, %s526_s9 }
  0x18   : > { %p535_p8 = scmp.lt.u32.totalorder %s526_s9, %s716_s4 }
  0x19   : > { %p530_p3 = pneg %p529_p2  ;;  %p534_p7 = por %p533_p5, %p532_p4 }
  0x1b   : > { %p536_p10 = por %p535_p8, %p534_p7 }
  0x1d   : > { %p537_p9 = pnand %p536_p10, %p530_p3 }
  0x1f   : > { %540 = shalt.err (!%p537_p9)
}
  0x20   : > { %s541_s22 = scalar_lea.vmem %s724_s6, 128  ;;  %s624_s26 = smov [#allocation2]  }
  0x21   : > { %p542_p0 = scmp.ne.s32.totalorder %s724_s6, %s541_s22  ;;  %s546_s27 = sshll.u32 %s624_s26, 4  ;;  %s547_s27 = int_to_ptr.vmem [resolvable:$false] %s546_s27 }
  0x22   : > { %s548_s28 = scalar_lea.vmem %s547_s27, 256  ;;  %p549_p11 = scmp.lt.s32.totalorder %s724_s6, %s547_s27 }
  0x23   : > { %p544_p2 = pnand %p542_p0, %p528_p1  ;;  %p550_p4 = scmp.lt.s32.totalorder %s548_s28, %s541_s22 }
  0x25   : > { %p545_p12 = pneg %p544_p2  ;;  %p551_p5 = por %p550_p4, %p549_p11 }
  0x27   : > { %p552_p7 = pnand %p551_p5, %p545_p12 }
  0x29   : > { %555 = shalt.err (!%p552_p7)
}
  0x2a   : > { %s625_s29 = smov 64   ;;  %s626_s30 = smov 4  }
  0x2b   : > { %474 = dma.hbm_to_vmem [thread:$0]  (!%p720_p13), %s716_s4, 128, %s724_s6, %s726_s8, %s625_s29, %s625_s29, %s626_s30  }
  0x2c   : > { %p457_p9 = scmp.ge.s32.totalorder %s622_s15, 1  ;;  %p156_p1 = scmp.lt.s32.totalorder %s622_s15, 3 }
  0x2e   : > { %p157_p3 = pnand %p457_p9, %p156_p1 }
  0x2f   : > { %s757_s5 = sand.u32 (!%p157_p3), 1, %s614_s13  }
  0x30   : > { %160 = sbr.rel (%p157_p3) target bundleno = 409 (0x199), region = 32  ;;  %s458_s9 = sshll.u32 (!%p157_p3), %s757_s5, 3 }
  0x31   : > { %s163_s10 = scalar_lea.sflag (!%p157_p3), [#allocation3], %s757_s5  ;;  %s166_s11 = scalar_lea.vmem (!%p157_p3), [#allocation2], %s458_s9 }
  0x37   : > { %601 = dma.done.wait (%p696_p6), %s163_s10, 128  }
  0x38   : > { %603 = vsyncadd (%p696_p6), %s163_s10, 4294967168  ;;  %v196_v0 = vlaneseq  ;;  %v627_v1 = vmov 1983009808   ;;  %v770_v6 = vld [vmem:[%s166_s11] sm:$0xf]  ;;  %vm213_vm0 = vcmask 1041408  }
  0x39   : > { %v194_v2 = vunpack.c.l.s4 %v627_v1  ;;  %v772_v7 = vld [vmem:[%s166_s11 + $0x4] sm:$0xf]  ;;  %v238_v9 = vmul.f32 %v770_v6, %v770_v6  ;;  %v628_v30 = vmov 0   ;;  %s188_s22 = scalar_lea.vmem [#allocation5], %s458_s9  ;;  %s466_s27 = sshll.u32 %s674_s16, 7 }
  0x3a   : > { %v767_v3 = vshrl.u32 %v196_v0, 7  ;;  %v239_v11 = vmul.f32 %v772_v7, %v772_v7  ;;  %520 = vset.pattern.permute.xlu0 %v628_v30  ;;  %521 = vset.pattern.permute.xlu1 %v628_v30  ;;  %s378_s26 = sshll.u32 %s188_s22, 4  ;;  %s815_s30 = scalar_lea.hbm %s862_s3, %s466_s27  ;;  %s810_s26 = int_to_ptr.vmem [resolvable:$true] %s378_s26 }
  0x3b   : > { %v195_v4 = vunpack.c.0.s8 %v194_v2  ;;  %s365_s9 = scalar_lea.sflag [#allocation4], %s757_s5  ;;  %s556_s10 = scalar_lea.vmem %s810_s26, 128 }
  0x3c   : > { %p557_p6 = scmp.ne.s32.totalorder %s810_s26, %s556_s10  ;;  %p869_p11 = scmp.ne.s32.totalorder %s866_s24, 0 }
  0x3d   : > { %v198_v5 = vsub.s32 %v195_v4, %v767_v3  ;;  %s630_s16 = smov [#allocation5]  }
  0x3e   : > { %p558_p12 = pnand %p557_p6, %p869_p11  ;;  %s560_s11 = sshll.u32 %s630_s16, 4  ;;  %s561_s11 = int_to_ptr.vmem [resolvable:$false] %s560_s11 }
  0x3f   : > { %v199_v8 = vrot.slane %v770_v6, %v198_v5  ;;  %v207_v10 = vrot.slane %v772_v7, %v198_v5  ;;  %v248_v14 = vrot.slane %v238_v9, %v198_v5  ;;  %v256_v17 = vrot.slane %v239_v11, %v198_v5  ;;  %s562_s23 = scalar_lea.vmem %s561_s11, 256  ;;  %p563_p8 = scmp.lt.s32.totalorder %s810_s26, %s561_s11 }
  0x40   : > { %p559_p13 = pneg %p558_p12  ;;  %p564_p10 = scmp.lt.s32.totalorder %s562_s23, %s556_s10 }
  0x41   : > { %v200_v12 = vcombine.high %v199_v8, %v199_v8  ;;  %v214_v13 = vsel %vm213_vm0, %v199_v8, 0.0  ;;  %v208_v15 = vcombine.high %v207_v10, %v207_v10  ;;  %v219_v16 = vsel %vm213_vm0, %v207_v10, 0.0 }
  0x42   : > { %v249_v19 = vcombine.high %v248_v14, %v248_v14  ;;  %v262_v20 = vsel %vm213_vm0, %v248_v14, 0.0  ;;  %v257_v23 = vcombine.high %v256_v17, %v256_v17  ;;  %v267_v25 = vsel %vm213_vm0, %v256_v17, 0.0  ;;  %v300_v14 = vld [vmem:[%s860_s1] sm:$0x3]  ;;  %v301_v17 = vld [vmem:[%s860_s1 + $0x2] sm:$0x3]  ;;  %p565_p0 = por %p564_p10, %p563_p8 }
  0x43   : > { %v215_v18 = vsel %vm213_vm0, %v200_v12, 0.0  ;;  %v220_v21 = vsel %vm213_vm0, %v208_v15, 0.0 }
  0x44   : > { %v216_v22 = vadd.f32 %v215_v18, %v214_v13  ;;  %v263_v24 = vsel %vm213_vm0, %v249_v19, 0.0  ;;  %v221_v27 = vadd.f32 %v220_v21, %v219_v16  ;;  %v268_v28 = vsel %vm213_vm0, %v257_v23, 0.0  ;;  %v302_v21 = vld [vmem:[%s861_s2] sm:$0x3]  ;;  %p566_p2 = pnand %p565_p0, %p559_p13 }
  0x45   : > { %v264_v26 = vadd.f32 %v263_v24, %v262_v20  ;;  %v269_v29 = vadd.f32 %v268_v28, %v267_v25  ;;  %v303_v24 = vld [vmem:[%s861_s2 + $0x2] sm:$0x3] }
  0x46   : > { %217 = vadd.xlane.f32.xlu0 %v216_v22 }
  0x47   : > { %265 = vadd.xlane.f32.xlu1 %v264_v26  ;;  %v629_v26 = vmov 269488144  }
  0x4a   : > { %222 = vadd.xlane.f32.xlu0 %v221_v27  ;;  %v319_v27 = vunpack.c.l.s4 %v629_v26 }
  0x4b   : > { %270 = vadd.xlane.f32.xlu1 %v269_v29 }
  0x4c   : > { %v320_v28 = vunpack.c.0.s8 %v319_v27 }
  0x4e   : > { %v323_v29 = vsub.s32 %v320_v28, %v767_v3 }
  0xd3   : > { %v218_v31 = vpop.xlane.xlu0 %217 }
  0xd4   : > { %v224_v32 = vsel %vm213_vm0, %v218_v31, 0.0  ;;  %v266_v34 = vpop.xlane.xlu1 %265 }
  0xd5   : > { %v225_v33 = vrot.slane %v224_v32, 4  ;;  %v272_v35 = vsel %vm213_vm0, %v266_v34, 0.0 }
  0xd6   : > { %v273_v37 = vrot.slane %v272_v35, 4 }
  0xd7   : > { %v226_v36 = vadd.f32 %v225_v33, %v224_v32  ;;  %v223_v38 = vpop.xlane.xlu0 %222 }
  0xd8   : > { %v231_v39 = vsel %vm213_vm0, %v223_v38, 0.0  ;;  %v274_v41 = vadd.f32 %v273_v37, %v272_v35  ;;  %v271_v43 = vpop.xlane.xlu1 %270 }
  0xd9   : > { %v227_v40 = vrot.slane %v226_v36, 2  ;;  %v232_v42 = vrot.slane %v231_v39, 4  ;;  %v279_v44 = vsel %vm213_vm0, %v271_v43, 0.0 }
  0xda   : > { %v275_v46 = vrot.slane %v274_v41, 2  ;;  %v280_v48 = vrot.slane %v279_v44, 4 }
  0xdb   : > { %v228_v45 = vadd.f32 %v227_v40, %v226_v36  ;;  %v233_v47 = vadd.f32 %v232_v42, %v231_v39 }
  0xdc   : > { %v276_v50 = vadd.f32 %v275_v46, %v274_v41  ;;  %v281_v52 = vadd.f32 %v280_v48, %v279_v44 }
  0xdd   : > { %v229_v49 = vrot.slane %v228_v45, 1  ;;  %v234_v51 = vrot.slane %v233_v47, 2 }
  0xde   : > { %v277_v54 = vrot.slane %v276_v50, 1  ;;  %v282_v56 = vrot.slane %v281_v52, 2 }
  0xdf   : > { %v230_v53 = vadd.f32 %v229_v49, %v228_v45  ;;  %v235_v55 = vadd.f32 %v234_v51, %v233_v47 }
  0xe0   : > { %v283_v59 = vadd.f32 %v282_v56, %v281_v52  ;;  %v278_v61 = vadd.f32 %v277_v54, %v276_v50 }
  0xe1   : > { %v286_v57 = vmul.f32 0.001953125, %v230_v53  ;;  %v236_v58 = vrot.slane %v235_v55, 1 }
  0xe2   : > { %v284_v63 = vrot.slane %v283_v59, 1 }
  0xe3   : > { %v288_v60 = vmul.f32 %v286_v57, %v230_v53  ;;  %v237_v62 = vadd.f32 %v236_v58, %v235_v55 }
  0xe4   : > { %v285_v5 = vadd.f32 %v284_v63, %v283_v59 }
  0xe5   : > { %v290_v0 = vsub.f32 %v278_v61, %v288_v60  ;;  %v287_v1 = vmul.f32 0.001953125, %v237_v62 }
  0xe7   : > { %v292_v2 = vmul.f32 0.0019569471, %v290_v0  ;;  %v289_v4 = vmul.f32 %v287_v1, %v237_v62 }
  0xe9   : > { %v294_v8 = vmax.f32 %v292_v2, 0.0  ;;  %v291_v9 = vsub.f32 %v285_v5, %v289_v4 }
  0xeb   : > { %v296_v10 = vadd.f32 1e-05, %v294_v8  ;;  %v293_v11 = vmul.f32 0.0019569471, %v291_v9 }
  0xed   : > { %522 = vrsqrt.f32 %v296_v10  ;;  %v295_v12 = vmax.f32 %v293_v11, 0.0 }
  0xef   : > { %v297_v13 = vadd.f32 1e-05, %v295_v12 }
  0xf1   : > { %524 = vrsqrt.f32 %v297_v13 }
  0xf7   : > { %v523_v15 = vpop.eup %522 }
  0xf8   : > { %v304_v16 = vmul.f32 %v523_v15, %v300_v14 }
  0xfa   : > { %312 = vperm.xlu0 %520, %v304_v16   ;;  %v306_v20 = vmul.f32 %v304_v16, %v286_v57 }
  0xfb   : > { %v525_v18 = vpop.eup %524 }
  0xfc   : > { %v305_v19 = vmul.f32 %v525_v18, %v301_v17  ;;  %v308_v22 = vsub.f32 %v302_v21, %v306_v20 }
  0xfe   : > { %316 = vperm.xlu1 %521, %v305_v19   ;;  %v307_v23 = vmul.f32 %v305_v19, %v287_v1 }
 0x100   : > { %v309_v25 = vsub.f32 %v303_v24, %v307_v23 }
 0x102   : > { %338 = vperm.xlu1 %521, %v308_v22  }
 0x106   : > { %342 = vperm.xlu1 %521, %v309_v25  }
 0x179   : > { %v313_v30 = vpop.permute.xlu0 %312 }
 0x17a   : > { %v324_v32 = vrot.slane %v313_v30, %v323_v29 }
 0x17c   : > { %v334_v34 = vmul.f32 %v324_v32, %v770_v6 }
 0x17d   : > { %v317_v31 = vpop.permute.xlu1 %316 }
 0x17e   : > { %v331_v35 = vrot.slane %v317_v31, %v323_v29 }
 0x180   : > { %v335_v39 = vmul.f32 %v331_v35, %v772_v7 }
 0x181   : > { %v339_v33 = vpop.permute.xlu1 %338 }
 0x182   : > { %v350_v36 = vrot.slane %v339_v33, %v323_v29 }
 0x184   : > { %v360_v37 = vadd.f32 %v350_v36, %v334_v34 }
 0x185   : > { %v343_v38 = vpop.permute.xlu1 %342 }
 0x186   : > { %362 = vst [vmem:[%s188_s22] sm:$0xf] %v360_v37  ;;  %v357_v3 = vrot.slane %v343_v38, %v323_v29 }
 0x188   : > { %v361_v6 = vadd.f32 %v357_v3, %v335_v39 }
 0x18a   : > { %363 = vst [vmem:[%s188_s22 + $0x4] sm:$0xf] %v361_v6 }
 0x18b   : > { %569 = shalt.err (!%p566_p2)
}
 0x18c   : > { %s570_s4 = scalar_lea.hbm %s815_s30, 128  ;;  %s574_s8 = scalar_lea.hbm %s862_s3, 256 }
 0x18d   : > { %p571_p4 = scmp.ne.s32.totalorder %s815_s30, %s570_s4  ;;  %p575_p9 = scmp.lt.u32.totalorder %s815_s30, %s862_s3 }
 0x18e   : > { %p576_p1 = scmp.lt.u32.totalorder %s574_s8, %s570_s4  ;;  %p578_p6 = scmp.lt.u32.totalorder %s570_s4, %s815_s30 }
 0x18f   : > { %p572_p5 = pnand %p571_p4, %p869_p11 }
 0x190   : > { %p577_p3 = por %p576_p1, %p575_p9 }
 0x191   : > { %p573_p7 = pneg %p572_p5 }
 0x192   : > { %p579_p12 = por %p578_p6, %p577_p3 }
 0x194   : > { %p580_p13 = pnand %p579_p12, %p573_p7 }
 0x196   : > { %583 = shalt.err (!%p580_p13)
}
 0x197   : > { %s631_s20 = smov 64   ;;  %s632_s22 = smov 4  }
 0x198   : > { %469 = dma.vmem_to_hbm [thread:$0]  (%p869_p11), %s810_s26, 128, %s815_s30, %s365_s9, %s631_s20, %s631_s20, %s632_s22  }
 0x199 PF: > { %s393_s27 = sand.u32 1, %s610_s12   ;;  %p870_p8 = scmp.ne.s32.totalorder %s867_s25, 0 }
 0x19a   : > { %p871_p10 = scmp.ge.s32.totalorder %s622_s15, 2  ;;  %s394_s28 = scalar_lea.sflag [#allocation4], %s393_s27 }
 0x19c   : > { %p476_p0 = pnand %p871_p10, %p870_p8 }
 0x19e   : > { %605 = dma.done.wait (!%p476_p0), %s394_s28, 128  }
 0x19f   : > { %607 = vsyncadd (!%p476_p0), %s394_s28, 4294967168  ;;  %p16_p2 = scmp.ge.s32.totalorder %s678_s18, 4   ;;  %s872_s12 = smov %s614_s13 }
 0x1a0   : > { %s873_s13 = smov %s618_s14  ;;  %s874_s14 = smov %s690_s21 }
 0x1a1   : > { %s875_s15 = smov %s678_s18  ;;  %18 = sbr.rel (!%p16_p2) target bundleno = 5 (0x5), region = 77 }
 0x1a8   :  { %399 = vsyncpa [#allocation3], 1 }
 0x1a9   :  { %401 = vsyncpa [#allocation3 + $0x1], 1 }
 0x1aa   :  { %402 = vsyncpa [#allocation4], 1 }
 0x1ab   :  { %404 = vsyncpa [#allocation4 + $0x1], 1 }

</bundles_post_ra>
